<compile_context>
chip_gen: v7x
topology: tpu7x:2x2x1
jax: 0.10.0
libtpu: 0.0.40
codegen_flags: <defaults>
</compile_context>

<pallas_src>
import jax
import jax.numpy as jnp
import numpy as np
from jax.experimental import pallas as pl
from jax.experimental.pallas import tpu as pltpu

_LANE = 128
_SUBLANE = 8
# 2048 rows * 128 lanes * 4 B = 1 MiB per f32 block; with 3 double-buffered
# inputs + accumulator + output this stays well under v7x's 32 MiB scoped
# VMEM default while being far past the measured ~85%-of-roofline knee.
_MAX_TILE_ROWS = 2048


def _elementwise_loss(p, t):
    # TODO(synk): BaseLoss.loss() is abstract (raises NotImplementedError in
    # PyTorch); an L1 elementwise loss is used as the concrete hot path so
    # forward()'s weighting + reduction scaffolding can be exercised.
    return jnp.abs(p - t)


# ---------------------------------------------------------------------------
# Kernels
# ---------------------------------------------------------------------------
def _sum_kernel_w(p_ref, t_ref, w_ref, out_ref, acc_ref):
    """Weighted sum: vector-accumulate per step, reduce once per chunk."""
    i = pl.program_id(1)

    @pl.when(i == 0)
    def _():
        acc_ref[...] = jnp.zeros_like(acc_ref)

    p = p_ref[...].astype(jnp.float32)
    t = t_ref[...].astype(jnp.float32)
    w = w_ref[...].astype(jnp.float32)
    acc_ref[...] += _elementwise_loss(p, t) * w

    @pl.when(i == pl.num_programs(1) - 1)
    def _():
        out_ref[...] = jnp.zeros_like(out_ref) + jnp.sum(acc_ref[...])


def _sum_kernel_nw(p_ref, t_ref, out_ref, acc_ref):
    """Unweighted sum (no weight stream DMA'd at all)."""
    i = pl.program_id(1)

    @pl.when(i == 0)
    def _():
        acc_ref[...] = jnp.zeros_like(acc_ref)

    p = p_ref[...].astype(jnp.float32)
    t = t_ref[...].astype(jnp.float32)
    acc_ref[...] += _elementwise_loss(p, t)

    @pl.when(i == pl.num_programs(1) - 1)
    def _():
        out_ref[...] = jnp.zeros_like(out_ref) + jnp.sum(acc_ref[...])


def _elem_kernel_w(p_ref, t_ref, w_ref, out_ref):
    p = p_ref[...].astype(jnp.float32)
    t = t_ref[...].astype(jnp.float32)
    w = w_ref[...].astype(jnp.float32)
    out_ref[...] = (_elementwise_loss(p, t) * w).astype(out_ref.dtype)


def _elem_kernel_nw(p_ref, t_ref, out_ref):
    p = p_ref[...].astype(jnp.float32)
    t = t_ref[...].astype(jnp.float32)
    out_ref[...] = _elementwise_loss(p, t).astype(out_ref.dtype)


# ---------------------------------------------------------------------------
# Host-side layout helpers
# ---------------------------------------------------------------------------
def _plan(n_elems, n_chunks=1):
    """Pick tile rows / grid so block rows are a multiple of 8 (or the full
    extent) and padding is minimal."""
    rows = -(-n_elems // _LANE)
    tile_rows = min(_MAX_TILE_ROWS, -(-rows // _SUBLANE) * _SUBLANE)
    n_blocks = -(-rows // tile_rows)
    if n_blocks < n_chunks:
        n_chunks = 1
    blocks_per_chunk = -(-n_blocks // n_chunks)
    rows_padded = n_chunks * blocks_per_chunk * tile_rows
    return tile_rows, n_chunks, blocks_per_chunk, rows_padded


def _prep_2d(x, rows_padded):
    """Flatten (free reshape); zero-pad the tail only if required; keep the
    native dtype so HBM traffic is not inflated by a host-side upcast."""
    flat = jnp.ravel(x)
    n = flat.shape[0]
    total = rows_padded * _LANE
    if total != n:
        flat = jnp.concatenate([flat, jnp.zeros((total - n,), flat.dtype)])
    return flat.reshape(rows_padded, _LANE)


def _input_bytes(operands):
    return sum(int(np.prod(o.shape)) * o.dtype.itemsize for o in operands)


# ---------------------------------------------------------------------------
# pallas_call wrappers
# ---------------------------------------------------------------------------
def _pallas_weighted_sum(preds, targets, weight, n_elems):
    tile_rows, n_chunks, bpc, rows_padded = _plan(n_elems, n_chunks=2)

    operands = [_prep_2d(preds, rows_padded), _prep_2d(targets, rows_padded)]
    if weight is not None:
        operands.append(_prep_2d(weight, rows_padded))
        kernel = _sum_kernel_w
    else:
        kernel = _sum_kernel_nw

    in_spec = pl.BlockSpec((tile_rows, _LANE), lambda c, i: (c * bpc + i, 0))
    cost = pl.CostEstimate(
        flops=4 * rows_padded * _LANE,
        transcendentals=0,
        bytes_accessed=_input_bytes(operands) + n_chunks * 4,
    )

    partials = pl.pallas_call(
        kernel,
        out_shape=jax.ShapeDtypeStruct((n_chunks, 1, 1), jnp.float32),
        grid_spec=pltpu.PrefetchScalarGridSpec(
            num_scalar_prefetch=0,
            grid=(n_chunks, bpc),
            in_specs=[in_spec] * len(operands),
            out_specs=pl.BlockSpec((1, 1, 1), lambda c, i: (c, 0, 0)),
            scratch_shapes=[pltpu.VMEM((tile_rows, _LANE), jnp.float32)],
        ),
        compiler_params=pltpu.CompilerParams(
            dimension_semantics=("parallel", "arbitrary")),
        cost_estimate=cost,
    )(*operands)
    # Tiny cross-chunk reduce (<= 2 elements) done in the wrapper.
    return jnp.sum(partials)


def _pallas_weighted_elem(preds, targets, weight, orig_shape):
    n_elems = int(np.prod(orig_shape))
    tile_rows, _, n_blocks, rows_padded = _plan(n_elems, n_chunks=1)

    operands = [_prep_2d(preds, rows_padded), _prep_2d(targets, rows_padded)]
    if weight is not None:
        operands.append(_prep_2d(weight, rows_padded))
        kernel = _elem_kernel_w
    else:
        kernel = _elem_kernel_nw

    spec = pl.BlockSpec((tile_rows, _LANE), lambda i: (i, 0))
    out_dtype = preds.dtype
    cost = pl.CostEstimate(
        flops=4 * rows_padded * _LANE,
        transcendentals=0,
        bytes_accessed=_input_bytes(operands)
        + rows_padded * _LANE * jnp.dtype(out_dtype).itemsize,
    )

    out2d = pl.pallas_call(
        kernel,
        out_shape=jax.ShapeDtypeStruct((rows_padded, _LANE), out_dtype),
        grid_spec=pltpu.PrefetchScalarGridSpec(
            num_scalar_prefetch=0,
            grid=(n_blocks,),
            in_specs=[spec] * len(operands),
            out_specs=spec,
        ),
        compiler_params=pltpu.CompilerParams(
            dimension_semantics=("parallel",)),
        cost_estimate=cost,
    )(*operands)

    flat = out2d.reshape(-1)
    if rows_padded * _LANE != n_elems:
        flat = flat[:n_elems]
    return flat.reshape(orig_shape)


# ---------------------------------------------------------------------------
# Module wrapper (semantics of BaseLoss.forward)
# ---------------------------------------------------------------------------
class BaseLossPallas:
    """Pallas/JAX port of modeling/losses.py::BaseLoss forward()."""

    def __init__(self, reduction: str = "mean", activation: str = "none",
                 loss_weight: float = 1.0):
        self.reduction = reduction
        self.activation = activation  # unused by BaseLoss.forward, kept for parity
        self.loss_weight = float(loss_weight)

    @property
    def name(self):
        return self.__class__.__name__

    def __call__(self, preds, targets, weight=None, avg_factor=None,
                 reduction_override=None):
        assert reduction_override in (None, "none", "mean", "sum")
        reduction = reduction_override if reduction_override else self.reduction

        orig_shape = preds.shape
        n_elems = int(np.prod(orig_shape))

        if weight is not None and tuple(weight.shape) != tuple(orig_shape):
            # TODO(synk): lower-rank weights are broadcast on the host; an
            # in-kernel broadcast would save HBM traffic but needs a
            # layout-specific index_map per broadcast pattern.
            weight = jnp.broadcast_to(weight, orig_shape)

        if avg_factor is None:
            if reduction == "mean":
                total = _pallas_weighted_sum(preds, targets, weight, n_elems)
                loss = total / jnp.float32(n_elems)
            elif reduction == "sum":
                loss = _pallas_weighted_sum(preds, targets, weight, n_elems)
            else:  # "none"
                loss = _pallas_weighted_elem(preds, targets, weight, orig_shape)
        elif reduction == "mean":
            eps = jnp.float32(np.finfo(np.float32).eps)
            total = _pallas_weighted_sum(preds, targets, weight, n_elems)
            loss = total / (avg_factor + eps)
        elif reduction != "none":
            raise ValueError('avg_factor can not be used with reduction="sum"')
        else:  # reduction == "none" with avg_factor
            loss = _pallas_weighted_elem(preds, targets, weight, orig_shape)

        return self.loss_weight * loss


if __name__ == "__main__":
    key = jax.random.PRNGKey(0)
    k1, k2, k3 = jax.random.split(key, 3)

    # Small shapes consistent with a typical NCHW prediction/target pair.
    preds = jax.random.normal(k1, (2, 4, 16, 16), jnp.float32)
    targets = jax.random.normal(k2, (2, 4, 16, 16), jnp.float32)
    weight = jax.random.uniform(k3, (2, 4, 16, 16), jnp.float32)

    loss_mod = BaseLossPallas(reduction="mean", loss_weight=1.0)

    # weighted paths
    out_mean = loss_mod(preds, targets, weight=weight)
    out_sum = loss_mod(preds, targets, weight=weight, reduction_override="sum")
    out_none = loss_mod(preds, targets, weight=weight, reduction_override="none")
    out_avg = loss_mod(preds, targets, weight=weight, avg_factor=100)
    # unweighted paths (no weight stream DMA'd)
    out_nw_mean = loss_mod(preds, targets)
    out_nw_none = loss_mod(preds, targets, reduction_override="none")
    # ragged shape exercising the minimal-pad path
    p_odd = jax.random.normal(k1, (2, 3, 7, 5), jnp.float32)
    t_odd = jax.random.normal(k2, (2, 3, 7, 5), jnp.float32)
    out_odd = loss_mod(p_odd, t_odd)

    jax.block_until_ready((out_mean, out_sum, out_none, out_avg,
                           out_nw_mean, out_nw_none, out_odd))

    # Sanity check against a pure-JAX reference.
    ref_elem = jnp.abs(preds - targets) * weight
    np.testing.assert_allclose(np.asarray(out_mean), np.asarray(ref_elem.mean()),
                               rtol=1e-5, atol=1e-5)
    np.testing.assert_allclose(np.asarray(out_sum), np.asarray(ref_elem.sum()),
                               rtol=1e-5, atol=1e-4)
    np.testing.assert_allclose(np.asarray(out_none), np.asarray(ref_elem),
                               rtol=1e-5, atol=1e-5)
    np.testing.assert_allclose(
        np.asarray(out_avg),
        np.asarray(ref_elem.sum() / (100 + np.finfo(np.float32).eps)),
        rtol=1e-5, atol=1e-5)
    np.testing.assert_allclose(np.asarray(out_nw_mean),
                               np.asarray(jnp.abs(preds - targets).mean()),
                               rtol=1e-5, atol=1e-5)
    np.testing.assert_allclose(np.asarray(out_nw_none),
                               np.asarray(jnp.abs(preds - targets)),
                               rtol=1e-5, atol=1e-5)
    np.testing.assert_allclose(np.asarray(out_odd),
                               np.asarray(jnp.abs(p_odd - t_odd).mean()),
                               rtol=1e-5, atol=1e-5)

    print("KERNEL_OK")
</pallas_src>

<mosaic_0001>
module attributes {stable_mosaic.version = 11 : i64} {
  func.func @_sum_kernel_w(%arg0: i32, %arg1: i32, %arg2: memref<16x128xf32, #tpu.memory_space<vmem>>, %arg3: memref<16x128xf32, #tpu.memory_space<vmem>>, %arg4: memref<16x128xf32, #tpu.memory_space<vmem>>, %arg5: memref<1x1x1xf32, #tpu.memory_space<vmem>>, %arg6: memref<16x128xf32, #tpu.memory_space<vmem>>) attributes {dimension_semantics = [#tpu.dimension_semantics<parallel>, #tpu.dimension_semantics<arbitrary>], iteration_bounds = array<i64: 1, 1>, scalar_prefetch = 0 : i64, scratch_operands = 1 : i64, tpu.core_type = #tpu.core_type<tc>, window_params = [{transform_indices = @transform_0, window_bounds = array<i64: 16, 128>}, {transform_indices = @transform_1, window_bounds = array<i64: 16, 128>}, {transform_indices = @transform_2, window_bounds = array<i64: 16, 128>}, {transform_indices = @transform_3, window_bounds = array<i64: 1, 1, 1>}]} {
    %c0_i32 = arith.constant 0 : i32
    %0 = arith.cmpi eq, %arg1, %c0_i32 : i32
    %1 = arith.extui %0 : i1 to i32
    %c0_i32_0 = arith.constant 0 : i32
    %2 = arith.cmpi ne, %1, %c0_i32_0 : i32
    scf.if %2 {
      %cst = arith.constant 0.000000e+00 : f32
      %15 = vector.broadcast %cst : f32 to vector<16x128xf32>
      %c0_12 = arith.constant 0 : index
      %c0_13 = arith.constant 0 : index
      %16 = vector.load %arg6[%c0_12, %c0_13] : memref<16x128xf32, #tpu.memory_space<vmem>>, vector<16x128xf32>
      tpu.vector_store %arg6[%c0_12, %c0_13], %15 {strides = array<i32>} : memref<16x128xf32, #tpu.memory_space<vmem>>, vector<16x128xf32>,
    } else {
    }
    %c0 = arith.constant 0 : index
    %c0_1 = arith.constant 0 : index
    %3 = vector.load %arg2[%c0, %c0_1] : memref<16x128xf32, #tpu.memory_space<vmem>>, vector<16x128xf32>
    %c0_2 = arith.constant 0 : index
    %c0_3 = arith.constant 0 : index
    %4 = vector.load %arg3[%c0_2, %c0_3] : memref<16x128xf32, #tpu.memory_space<vmem>>, vector<16x128xf32>
    %c0_4 = arith.constant 0 : index
    %c0_5 = arith.constant 0 : index
    %5 = vector.load %arg4[%c0_4, %c0_5] : memref<16x128xf32, #tpu.memory_space<vmem>>, vector<16x128xf32>
    %c0_6 = arith.constant 0 : index
    %c0_7 = arith.constant 0 : index
    %6 = vector.load %arg6[%c0_6, %c0_7] : memref<16x128xf32, #tpu.memory_space<vmem>>, vector<16x128xf32>
    %7 = arith.subf %3, %4 : vector<16x128xf32>
    %8 = math.absf %7 : vector<16x128xf32>
    %9 = arith.mulf %8, %5 : vector<16x128xf32>
    %10 = arith.addf %6, %9 : vector<16x128xf32>
    %c0_8 = arith.constant 0 : index
    %c0_9 = arith.constant 0 : index
    %11 = vector.load %arg6[%c0_8, %c0_9] : memref<16x128xf32, #tpu.memory_space<vmem>>, vector<16x128xf32>
    tpu.vector_store %arg6[%c0_8, %c0_9], %10 {strides = array<i32>} : memref<16x128xf32, #tpu.memory_space<vmem>>, vector<16x128xf32>,
    %c0_i32_10 = arith.constant 0 : i32
    %12 = arith.cmpi eq, %arg1, %c0_i32_10 : i32
    %13 = arith.extui %12 : i1 to i32
    %c0_i32_11 = arith.constant 0 : i32
    %14 = arith.cmpi ne, %13, %c0_i32_11 : i32
    scf.if %14 {
      %cst = arith.constant 0.000000e+00 : f32
      %15 = vector.broadcast %cst : f32 to vector<1x1x1xf32>
      %c0_12 = arith.constant 0 : index
      %c0_13 = arith.constant 0 : index
      %16 = vector.load %arg6[%c0_12, %c0_13] : memref<16x128xf32, #tpu.memory_space<vmem>>, vector<16x128xf32>
      %17 = vector.shape_cast %16 : vector<16x128xf32> to vector<1x16x128xf32>
      %cst_14 = arith.constant dense<0.000000e+00> : vector<1xf32>
      %18 = vector.multi_reduction <add>, %17, %cst_14 [1, 2] : vector<1x16x128xf32> to vector<1xf32>
      %19 = vector.shape_cast %18 : vector<1xf32> to vector<1x1x1xf32>
      %20 = vector.extract %19[0, 0, 0] : f32 from vector<1x1x1xf32>
      %21 = vector.broadcast %20 : f32 to vector<1x1x1xf32>
      %22 = arith.addf %15, %21 : vector<1x1x1xf32>
      %c0_15 = arith.constant 0 : index
      %c0_16 = arith.constant 0 : index
      %c0_17 = arith.constant 0 : index
      %23 = vector.load %arg5[%c0_15, %c0_16, %c0_17] : memref<1x1x1xf32, #tpu.memory_space<vmem>>, vector<1x1x1xf32>
      tpu.vector_store %arg5[%c0_15, %c0_16, %c0_17], %22 {strides = array<i32>} : memref<1x1x1xf32, #tpu.memory_space<vmem>>, vector<1x1x1xf32>,
    } else {
    }
    return
  }
  func.func @transform_0(%arg0: i32, %arg1: i32) -> (i32, i32) {
    %c1_i32 = arith.constant 1 : i32
    %0 = arith.muli %arg0, %c1_i32 : i32
    %1 = arith.addi %0, %arg1 : i32
    %c0_i32 = arith.constant 0 : i32
    %c0_i32_0 = arith.constant 0 : i32
    return %1, %c0_i32 : i32, i32
  }
  func.func @transform_1(%arg0: i32, %arg1: i32) -> (i32, i32) {
    %c1_i32 = arith.constant 1 : i32
    %0 = arith.muli %arg0, %c1_i32 : i32
    %1 = arith.addi %0, %arg1 : i32
    %c0_i32 = arith.constant 0 : i32
    %c0_i32_0 = arith.constant 0 : i32
    return %1, %c0_i32 : i32, i32
  }
  func.func @transform_2(%arg0: i32, %arg1: i32) -> (i32, i32) {
    %c1_i32 = arith.constant 1 : i32
    %0 = arith.muli %arg0, %c1_i32 : i32
    %1 = arith.addi %0, %arg1 : i32
    %c0_i32 = arith.constant 0 : i32
    %c0_i32_0 = arith.constant 0 : i32
    return %1, %c0_i32 : i32, i32
  }
  func.func @transform_3(%arg0: i32, %arg1: i32) -> (i32, i32, i32) {
    %c0_i32 = arith.constant 0 : i32
    %c0_i32_0 = arith.constant 0 : i32
    %c0_i32_1 = arith.constant 0 : i32
    return %arg0, %c0_i32, %c0_i32_0 : i32, i32, i32
  }
}

</mosaic_0001>

<bundles_post_ra>
// kernel: tpu_custom_call.1
= control target key start
LH: loop header
LB: loop body
LE: loop exit
PB: predicated region body
PF: predicated region fallthrough
CT: control target
= control target key end

     0   :  { %8 = vsyncpa [#allocation4], 0  ;;  %s325_s0 = inlined_call_operand.hbm [shape: f32[16,128], index: 0, kind: input, shape index: {}]   ;;  %s326_s1 = inlined_call_operand.hbm [shape: f32[16,128], index: 1, kind: input, shape index: {}]   ;;  %s327_s2 = inlined_call_operand.hbm [shape: f32[16,128], index: 2, kind: input, shape index: {}]   ;;  %s328_s3 = inlined_call_operand.hbm [shape: f32[1,1,1], index: 3, kind: output, shape index: {}]  }
   0x1   :  { %9 = vsyncpa [#allocation7], 0 }
   0x2   :  { %10 = vsyncpa [#allocation5], 0  ;;  %s235_s12 = smov [#allocation6]   ;;  %s236_s14 = smov [#allocation3]  }
   0x3   :  { %s36_s13 = sshll.u32 %s235_s12, 4  ;;  %s20_s15 = sshll.u32 %s236_s14, 4  ;;  %s37_s13 = int_to_ptr.vmem [resolvable:$true] %s36_s13  ;;  %s261_s15 = int_to_ptr.vmem [resolvable:$true] %s20_s15 }
   0x4   :  { %s141_s18 = scalar_lea.hbm %s326_s1, 256 }
   0x5   :  { %p142_p0 = scmp.ne.s32.totalorder %s326_s1, %s141_s18  ;;  %p145_p1 = scmp.lt.u32.totalorder %s141_s18, %s326_s1 }
   0x7   :  { %p147_p2 = pnand %p145_p1, %p142_p0 }
   0x9   :  { %150 = shalt.err (!%p147_p2)
}
   0xa   :  { %s151_s23 = scalar_lea.vmem %s37_s13, 256  ;;  %p156_p4 = scmp.lt.s32.totalorder %s37_s13, %s37_s13 }
   0xb   :  { %p152_p3 = scmp.ne.s32.totalorder %s37_s13, %s151_s23  ;;  %p157_p5 = scmp.lt.s32.totalorder %s151_s23, %s151_s23 }
   0xd   :  { %p158_p6 = por %p157_p5, %p156_p4 }
   0xf   :  { %p159_p7 = pnand %p158_p6, %p152_p3 }
  0x11   :  { %162 = shalt.err (!%p159_p7)
}
  0x12   :  { %s237_s24 = smov 128   ;;  %s238_s25 = smov 8  }
  0x13   :  { %42 = dma.hbm_to_vmem [thread:$0]  %s326_s1, 256, %s37_s13, [#allocation7], %s237_s24, %s237_s24, %s238_s25  }
  0x14   :  { %s163_s30 = scalar_lea.hbm %s325_s0, 256 }
  0x15   :  { %p164_p8 = scmp.ne.s32.totalorder %s325_s0, %s163_s30  ;;  %p167_p9 = scmp.lt.u32.totalorder %s163_s30, %s325_s0 }
  0x17   :  { %p169_p10 = pnand %p167_p9, %p164_p8 }
  0x19   :  { %172 = shalt.err (!%p169_p10)
}
  0x1a   :  { %s173_s8 = scalar_lea.vmem %s261_s15, 256  ;;  %p178_p12 = scmp.lt.s32.totalorder %s261_s15, %s261_s15 }
  0x1b   :  { %p174_p11 = scmp.ne.s32.totalorder %s261_s15, %s173_s8  ;;  %p179_p13 = scmp.lt.s32.totalorder %s173_s8, %s173_s8 }
  0x1d   :  { %p180_p0 = por %p179_p13, %p178_p12 }
  0x1f   :  { %p181_p1 = pnand %p180_p0, %p174_p11 }
  0x21   :  { %184 = shalt.err (!%p181_p1)
}
  0x22   :  { %26 = dma.hbm_to_vmem [thread:$0]  %s325_s0, 256, %s261_s15, [#allocation4], %s237_s24, %s237_s24, %s238_s25  }
  0x23   :  { %s239_s10 = smov [#allocation8]   ;;  %s185_s14 = scalar_lea.hbm %s327_s2, 256 }
  0x24   :  { %s52_s11 = sshll.u32 %s239_s10, 4  ;;  %p186_p2 = scmp.ne.s32.totalorder %s327_s2, %s185_s14  ;;  %s53_s11 = int_to_ptr.vmem [resolvable:$true] %s52_s11 }
  0x25   :  { %p189_p3 = scmp.lt.u32.totalorder %s185_s14, %s327_s2 }
  0x27   :  { %p191_p4 = pnand %p189_p3, %p186_p2 }
  0x29   :  { %194 = shalt.err (!%p191_p4)
}
  0x2a   :  { %s195_s20 = scalar_lea.vmem %s53_s11, 256  ;;  %p200_p6 = scmp.lt.s32.totalorder %s53_s11, %s53_s11 }
  0x2b   :  { %p196_p5 = scmp.ne.s32.totalorder %s53_s11, %s195_s20  ;;  %p201_p7 = scmp.lt.s32.totalorder %s195_s20, %s195_s20 }
  0x2d   :  { %p202_p8 = por %p201_p7, %p200_p6 }
  0x2f   :  { %p203_p9 = pnand %p202_p8, %p196_p5 }
  0x31   :  { %206 = shalt.err (!%p203_p9)
}
  0x32   :  { %58 = dma.hbm_to_vmem [thread:$0]  %s327_s2, 256, %s53_s11, [#allocation7], %s237_s24, %s237_s24, %s238_s25  }
  0x33   :  { %229 = dma.done.wait [#allocation4], 256  }
  0x34   :  { %230 = vsyncadd [#allocation4], 4294967040 }
  0x35   :  { %231 = dma.done.wait [#allocation7], 512  }
  0x36   :  { %232 = vsyncadd [#allocation7], 4294966784  ;;  %v80_v0 = vld [vmem:[#allocation3] sm:$0xff]  ;;  %v81_v1 = vld [vmem:[#allocation3 + $0x8] sm:$0xff]  ;;  %s240_s2 = smov [#allocation9]   ;;  %vm115_vm0 = vcmask 0  }
  0x37   :  { %v82_v2 = vld [vmem:[#allocation6] sm:$0xff]  ;;  %v83_v3 = vld [vmem:[#allocation6 + $0x8] sm:$0xff]  ;;  %v84_v5 = vld [vmem:[#allocation8] sm:$0xff]  ;;  %s123_s21 = sshll.u32 %s240_s2, 4  ;;  %s124_s21 = int_to_ptr.vmem [resolvable:$true] %s123_s21 }
  0x38   :  { %v88_v4 = vsub.f32 %v80_v0, %v82_v2  ;;  %v89_v6 = vsub.f32 %v81_v1, %v83_v3  ;;  %v85_v7 = vld [vmem:[#allocation8 + $0x8] sm:$0xff]  ;;  %s207_s23 = scalar_lea.vmem %s124_s21, 16  ;;  %s211_s24 = scalar_lea.vmem %s124_s21, 32 }
  0x39   :  { %p208_p10 = scmp.ne.s32.totalorder %s124_s21, %s207_s23  ;;  %p212_p11 = scmp.lt.s32.totalorder %s124_s21, %s124_s21 }
  0x3a   :  { %v90_v8 = vand.u32 2147483647, %v88_v4  ;;  %v91_v9 = vand.u32 2147483647, %v89_v6  ;;  %p213_p12 = scmp.lt.s32.totalorder %s211_s24, %s207_s23 }
  0x3c   :  { %v92_v10 = vmul.f32 %v90_v8, %v84_v5  ;;  %v93_v11 = vmul.f32 %v91_v9, %v85_v7  ;;  %p214_p13 = por %p213_p12, %p212_p11 }
  0x3e   :  { %v103_v12 = vadd.f32 %v93_v11, %v92_v10  ;;  %p215_p0 = pnand %p214_p13, %p208_p10 }
  0x40   :  { %104 = vadd.xlane.f32.xlu0 %v103_v12 }
  0xcd   :  { %v105_v13 = vpop.xlane.xlu0 %104 }
  0xce   :  { %v106_v14 = vrot.slane %v105_v13, 4 }
  0xd0   :  { %v107_v15 = vadd.f32 %v106_v14, %v105_v13 }
  0xd2   :  { %v108_v16 = vrot.slane %v107_v15, 2 }
  0xd4   :  { %v109_v17 = vadd.f32 %v108_v16, %v107_v15 }
  0xd6   :  { %v110_v18 = vrot.slane %v109_v17, 1 }
  0xd8   :  { %v111_v19 = vadd.f32 %v110_v18, %v109_v17 }
  0xda   :  { %133 = vpush %v111_v19 }
 0x10b   :  { %s134_s22 = spop %133 }
 0x10c   :  { %v113_v20 = vstv %s134_s22 }
 0x10d   :  { %116 = vst.msk [vmem:[#allocation9] sm:$0x1] %vm115_vm0, %v113_v20 }
 0x10e   :  { %218 = shalt.err (!%p215_p0)
}
 0x10f   :  { %s219_s27 = scalar_lea.hbm %s328_s3, 16 }
 0x110   :  { %p220_p1 = scmp.ne.s32.totalorder %s328_s3, %s219_s27  ;;  %p223_p2 = scmp.lt.u32.totalorder %s219_s27, %s328_s3 }
 0x112   :  { %p225_p3 = pnand %p223_p2, %p220_p1 }
 0x114   :  { %228 = shalt.err (!%p225_p3)
}
 0x115   :  { %126 = dma.vmem_to_hbm [thread:$0]  %s124_s21, 16, %s328_s3, [#allocation5]  }
 0x116   :  { %233 = dma.done.wait [#allocation5], 16  }
 0x117   :  { %234 = vsyncadd [#allocation5], 4294967280 }
 0x118   :  { %130 = vsyncpa [#allocation4], 1 }
 0x119   :  { %131 = vsyncpa [#allocation7], 1 }
 0x11a   :  { %132 = vsyncpa [#allocation5], 1 }

</bundles_post_ra>
